<compile_context>
chip_gen: v7x
topology: tpu7x:2x2x1
jax: 0.10.0
libtpu: 0.0.40
codegen_flags: <defaults>
</compile_context>

<pallas_src>
import jax
import jax.numpy as jnp
from jax.experimental import pallas as pl
from jax.experimental.pallas import tpu as pltpu

IN_F = 28 * 28          # 784, streamed unpadded (full-dim block is legal)
HID_PAD = 128           # lane-dense hidden dim (hidden_size <= 128 here)
OUT_F = 10              # logits written unpadded to HBM
OUT_F_PAD = 128         # w2 kept lane-dense for a full MXU tile
SUBLANE = 8
MAX_TB = 1024           # f32 batch tile: ~3.1 MiB x 2 buffers, safe on v7x
SMALL_CUTOFF = 1024     # <= this many rows: gridless, fully VMEM-resident
VMEM_LIMIT = 32 * 1024 * 1024


def _round_up(x, m):
    return (x + m - 1) // m * m


def _cdiv(a, b):
    return (a + b - 1) // b


def mlp_kernel(x_ref, w1_ref, b1_ref, w2_ref, b2_ref, out_ref):
    # fc1 + bias + ReLU (f32 accumulation regardless of streamed dtype)
    h = jnp.dot(x_ref[...], w1_ref[...], preferred_element_type=jnp.float32)
    h = jnp.maximum(h + b1_ref[...], 0.0)
    # fc2 on a full lane-dense 128x128 MXU tile, slice to the 10 real logits
    o = jnp.dot(h.astype(w2_ref.dtype), w2_ref[...],
                preferred_element_type=jnp.float32)
    out_ref[...] = (o[:, :out_ref.shape[1]] + b2_ref[...]).astype(out_ref.dtype)


def pack_params(w1, b1, w2, b2, *, compute_dtype=jnp.float32):
    """One-time param packing to lane-dense shapes.

    w1: (784, H), b1: (1, H), w2: (H, 10), b2: (1, 10)  (transposed vs. PyTorch).
    Returns w1p (784, Hp), b1p (1, Hp), w2p (Hp, 128), b2p (1, 10).
    """
    in_f, hid = w1.shape
    hid_pad = max(HID_PAD, _round_up(hid, 128))
    w1p = jnp.zeros((in_f, hid_pad), compute_dtype).at[:, :hid].set(
        w1.astype(compute_dtype))
    b1p = jnp.zeros((1, hid_pad), jnp.float32).at[:, :hid].set(
        b1.reshape(1, hid).astype(jnp.float32))
    w2p = jnp.zeros((hid_pad, OUT_F_PAD), compute_dtype).at[:hid, :OUT_F].set(
        w2.astype(compute_dtype))
    b2p = b2.reshape(1, OUT_F).astype(jnp.float32)
    return w1p, b1p, w2p, b2p


def my_network_forward(x, w1p, b1p, w2p, b2p, *,
                       max_tb=MAX_TB, small_cutoff=SMALL_CUTOFF):
    """x: (B, 1, 28, 28) or (B, 784). Params from pack_params(). -> (B, 10) f32."""
    B = x.shape[0]
    x2d = x.reshape(B, -1).astype(w1p.dtype)     # nn.Flatten, no zero-pad copy
    in_f = x2d.shape[1]

    param_bytes = sum(int(a.size) * a.dtype.itemsize
                      for a in (w1p, b1p, w2p, b2p))
    cost = pl.CostEstimate(
        flops=2 * B * (in_f * w1p.shape[1] + w2p.shape[0] * OUT_F_PAD),
        transcendentals=0,
        bytes_accessed=int(x2d.size) * x2d.dtype.itemsize + param_bytes
        + B * OUT_F * 4)

    out_shape = jax.ShapeDtypeStruct((B, OUT_F), jnp.float32)
    vmem_spec = pl.BlockSpec(memory_space=pltpu.MemorySpace.VMEM)

    if B <= small_cutoff:
        # Gridless: whole problem resident in VMEM, no pipeline machinery.
        return pl.pallas_call(
            mlp_kernel,
            out_shape=out_shape,
            in_specs=[vmem_spec] * 5,
            out_specs=vmem_spec,
            compiler_params=pltpu.CompilerParams(vmem_limit_bytes=VMEM_LIMIT),
            cost_estimate=cost,
        )(x2d, w1p, b1p, w2p, b2p)

    # Batch-tiled pipelined path. Guarantee >= 2 grid steps so the "parallel"
    # axis can be sharded across both v7x TensorCores (no-op on v5e/v6e).
    tb = min(max_tb, _round_up(_cdiv(B, 2), SUBLANE))
    grid = (_cdiv(B, tb),)
    return pl.pallas_call(
        mlp_kernel,
        out_shape=out_shape,
        grid=grid,
        in_specs=[
            pl.BlockSpec((tb, in_f), lambda i: (i, 0)),   # streamed activations
            vmem_spec,   # w1: VMEM-resident, not double-buffered
            vmem_spec,   # b1
            vmem_spec,   # w2
            vmem_spec,   # b2
        ],
        out_specs=pl.BlockSpec((tb, OUT_F), lambda i: (i, 0)),
        compiler_params=pltpu.CompilerParams(
            dimension_semantics=("parallel",),
            vmem_limit_bytes=VMEM_LIMIT),
        cost_estimate=cost,
    )(x2d, w1p, b1p, w2p, b2p)


def init_params(key, hidden_size):
    """Deterministic init matching PyTorch Linear shapes (stored transposed)."""
    k1, k2, k3, k4 = jax.random.split(key, 4)
    bound1 = 1.0 / jnp.sqrt(IN_F)
    bound2 = 1.0 / jnp.sqrt(hidden_size)
    w1 = jax.random.uniform(k1, (IN_F, hidden_size), jnp.float32, -bound1, bound1)
    b1 = jax.random.uniform(k2, (1, hidden_size), jnp.float32, -bound1, bound1)
    w2 = jax.random.uniform(k3, (hidden_size, OUT_F), jnp.float32, -bound2, bound2)
    b2 = jax.random.uniform(k4, (1, OUT_F), jnp.float32, -bound2, bound2)
    return w1, b1, w2, b2


if __name__ == "__main__":
    key = jax.random.PRNGKey(0)
    kx, kp, kx2 = jax.random.split(key, 3)

    hidden_size = 32
    w1, b1, w2, b2 = init_params(kp, hidden_size)
    w1p, b1p, w2p, b2p = pack_params(w1, b1, w2, b2)   # one-time param packing

    def ref_fwd(xin):
        xf = xin.reshape(xin.shape[0], -1)
        return jnp.maximum(xf @ w1 + b1, 0.0) @ w2 + b2

    # Small batch -> gridless, fully VMEM-resident path.
    x_small = jax.random.normal(kx, (8, 1, 28, 28), jnp.float32)
    out_small = jax.block_until_ready(
        my_network_forward(x_small, w1p, b1p, w2p, b2p))
    assert out_small.shape == (8, 10)
    # Loose-ish tolerance: f32 matmuls may take bf16 MXU passes depending on
    # backend precision defaults (both kernel and reference are affected).
    assert jnp.allclose(out_small, ref_fwd(x_small), atol=2e-2, rtol=2e-2)

    # Larger, non-tile-multiple batch -> batch-tiled path with a masked partial
    # edge block (garbage rows never land in rows < B).
    x_big = jax.random.normal(kx2, (1100, 1, 28, 28), jnp.float32)
    out_big = jax.block_until_ready(
        my_network_forward(x_big, w1p, b1p, w2p, b2p))
    assert out_big.shape == (1100, 10)
    assert jnp.allclose(out_big, ref_fwd(x_big), atol=2e-2, rtol=2e-2)

    print("KERNEL_OK")
</pallas_src>

<mosaic_0001>
module attributes {stable_mosaic.version = 11 : i64} {
  func.func @mlp_kernel(%arg0: memref<8x784xf32, #tpu.memory_space<vmem>>, %arg1: memref<784x128xf32, #tpu.memory_space<vmem>>, %arg2: memref<1x128xf32, #tpu.memory_space<vmem>>, %arg3: memref<128x128xf32, #tpu.memory_space<vmem>>, %arg4: memref<1x10xf32, #tpu.memory_space<vmem>>, %arg5: memref<8x10xf32, #tpu.memory_space<vmem>>) attributes {dimension_semantics = [], scalar_prefetch = 0 : i64, scratch_operands = 0 : i64, tpu.core_type = #tpu.core_type<tc>} {
    %c0 = arith.constant 0 : index
    %c0_0 = arith.constant 0 : index
    %0 = vector.load %arg0[%c0, %c0_0] : memref<8x784xf32, #tpu.memory_space<vmem>>, vector<8x784xf32>
    %c0_1 = arith.constant 0 : index
    %c0_2 = arith.constant 0 : index
    %1 = vector.load %arg1[%c0_1, %c0_2] : memref<784x128xf32, #tpu.memory_space<vmem>>, vector<784x128xf32>
    %cst = arith.constant dense<0.000000e+00> : vector<8x128xf32>
    %2 = tpu.matmul %0, %1, %cst {dimension_numbers = #tpu.dot_dimension_numbers<[1], [0], [0], [1], [0, 0, 1, 1], [], []>} : vector<8x784xf32>, vector<784x128xf32>, vector<8x128xf32> -> vector<8x128xf32>
    %c0_3 = arith.constant 0 : index
    %c0_4 = arith.constant 0 : index
    %3 = vector.load %arg2[%c0_3, %c0_4] : memref<1x128xf32, #tpu.memory_space<vmem>>, vector<1x128xf32>
    %4 = vector.broadcast %3 : vector<1x128xf32> to vector<8x128xf32>
    %5 = arith.addf %2, %4 : vector<8x128xf32>
    %cst_5 = arith.constant 0.000000e+00 : f32
    %6 = vector.broadcast %cst_5 : f32 to vector<8x128xf32>
    %7 = arith.maximumf %5, %6 : vector<8x128xf32>
    %c0_6 = arith.constant 0 : index
    %c0_7 = arith.constant 0 : index
    %8 = vector.load %arg3[%c0_6, %c0_7] : memref<128x128xf32, #tpu.memory_space<vmem>>, vector<128x128xf32>
    %cst_8 = arith.constant dense<0.000000e+00> : vector<8x128xf32>
    %9 = tpu.matmul %7, %8, %cst_8 {dimension_numbers = #tpu.dot_dimension_numbers<[1], [0], [0], [1], [0, 0, 1, 1], [], []>} : vector<8x128xf32>, vector<128x128xf32>, vector<8x128xf32> -> vector<8x128xf32>
    %10 = vector.extract_strided_slice %9 {offsets = [0, 0], sizes = [8, 10], strides = [1, 1]} : vector<8x128xf32> to vector<8x10xf32>
    %c0_9 = arith.constant 0 : index
    %c0_10 = arith.constant 0 : index
    %11 = vector.load %arg4[%c0_9, %c0_10] : memref<1x10xf32, #tpu.memory_space<vmem>>, vector<1x10xf32>
    %12 = vector.broadcast %11 : vector<1x10xf32> to vector<8x10xf32>
    %13 = arith.addf %10, %12 : vector<8x10xf32>
    %c0_11 = arith.constant 0 : index
    %c0_12 = arith.constant 0 : index
    %14 = vector.load %arg5[%c0_11, %c0_12] : memref<8x10xf32, #tpu.memory_space<vmem>>, vector<8x10xf32>
    tpu.vector_store %arg5[%c0_11, %c0_12], %13 {strides = array<i32>} : memref<8x10xf32, #tpu.memory_space<vmem>>, vector<8x10xf32>,
    return
  }
}

</mosaic_0001>

<bundles_post_ra>
// kernel: tpu_custom_call.1
= control target key start
LH: loop header
LB: loop body
LE: loop exit
PB: predicated region body
PF: predicated region fallthrough
CT: control target
= control target key end

     0   :  { %10 = vsyncpa [#allocation3], 0  ;;  %s1073_s0 = inlined_call_operand.hbm [shape: f32[8,784], index: 0, kind: input, shape index: {}]   ;;  %s1074_s1 = inlined_call_operand.hbm [shape: f32[784,128], index: 1, kind: input, shape index: {}]   ;;  %s1075_s2 = inlined_call_operand.vmem [shape: f32[1,128], index: 2, kind: input, shape index: {}]   ;;  %s1076_s3 = inlined_call_operand.hbm [shape: f32[128,128], index: 3, kind: input, shape index: {}]   ;;  %s1077_s4 = inlined_call_operand.vmem [shape: f32[1,10], index: 4, kind: input, shape index: {}]   ;;  %s1078_s5 = inlined_call_operand.hbm [shape: f32[8,10], index: 5, kind: output, shape index: {}]  }
   0x1   :  { %11 = vsyncpa [#allocation6], 0 }
   0x2   :  { %12 = vsyncpa [#allocation4], 0  ;;  %s965_s18 = smov [#allocation5]   ;;  %s871_s22 = scalar_lea.hbm %s1074_s1, 12544 }
   0x3   :  { %s28_s19 = sshll.u32 %s965_s18, 4  ;;  %p872_p0 = scmp.ne.s32.totalorder %s1074_s1, %s871_s22  ;;  %s29_s19 = int_to_ptr.vmem [resolvable:$true] %s28_s19 }
   0x4   :  { %p875_p1 = scmp.lt.u32.totalorder %s871_s22, %s1074_s1 }
   0x6   :  { %p877_p2 = pnand %p875_p1, %p872_p0 }
   0x8   :  { %880 = shalt.err (!%p877_p2)
}
   0x9   :  { %s881_s27 = scalar_lea.vmem %s29_s19, 12544  ;;  %p886_p4 = scmp.lt.s32.totalorder %s29_s19, %s29_s19 }
   0xa   :  { %p882_p3 = scmp.ne.s32.totalorder %s29_s19, %s881_s27  ;;  %p887_p5 = scmp.lt.s32.totalorder %s881_s27, %s881_s27 }
   0xc   :  { %p888_p6 = por %p887_p5, %p886_p4 }
   0xe   :  { %p889_p7 = pnand %p888_p6, %p882_p3 }
  0x10   :  { %892 = shalt.err (!%p889_p7)
}
  0x11   :  { %s966_s28 = smov 128   ;;  %s967_s29 = smov 8  }
  0x12   :  { %34 = dma.hbm_to_vmem [thread:$0]  %s1074_s1, 12544, %s29_s19, [#allocation6], %s966_s28, %s966_s28, %s967_s29  }
  0x13   :  { %s968_s7 = smov [#allocation2]   ;;  %s969_s9 = smov [#allocation7]  }
  0x14   :  { %s19_s8 = sshll.u32 %s968_s7, 4  ;;  %s42_s10 = sshll.u32 %s969_s9, 4  ;;  %s20_s8 = int_to_ptr.vmem [resolvable:$true] %s19_s8  ;;  %s43_s10 = int_to_ptr.vmem [resolvable:$true] %s42_s10 }
  0x15   :  { %s893_s13 = scalar_lea.hbm %s1073_s0, 896 }
  0x16   :  { %p894_p8 = scmp.ne.s32.totalorder %s1073_s0, %s893_s13  ;;  %p897_p9 = scmp.lt.u32.totalorder %s893_s13, %s1073_s0 }
  0x18   :  { %p899_p10 = pnand %p897_p9, %p894_p8 }
  0x1a   :  { %902 = shalt.err (!%p899_p10)
}
  0x1b   :  { %s903_s1 = scalar_lea.vmem %s20_s8, 896  ;;  %p908_p12 = scmp.lt.s32.totalorder %s20_s8, %s20_s8 }
  0x1c   :  { %p904_p11 = scmp.ne.s32.totalorder %s20_s8, %s903_s1  ;;  %p909_p13 = scmp.lt.s32.totalorder %s903_s1, %s903_s1 }
  0x1e   :  { %p910_p0 = por %p909_p13, %p908_p12 }
  0x20   :  { %p911_p1 = pnand %p910_p0, %p904_p11 }
  0x22   :  { %914 = shalt.err (!%p911_p1)
}
  0x23   :  { %22 = dma.hbm_to_vmem [thread:$0]  %s1073_s0, 896, %s20_s8, [#allocation3]  }
  0x24   :  { %s915_s22 = scalar_lea.hbm %s1076_s3, 2048 }
  0x25   :  { %p916_p2 = scmp.ne.s32.totalorder %s1076_s3, %s915_s22  ;;  %p919_p3 = scmp.lt.u32.totalorder %s915_s22, %s1076_s3 }
  0x27   :  { %p921_p4 = pnand %p919_p3, %p916_p2 }
  0x29   :  { %924 = shalt.err (!%p921_p4)
}
  0x2a   :  { %s925_s27 = scalar_lea.vmem %s43_s10, 2048  ;;  %p930_p6 = scmp.lt.s32.totalorder %s43_s10, %s43_s10 }
  0x2b   :  { %p926_p5 = scmp.ne.s32.totalorder %s43_s10, %s925_s27  ;;  %p931_p7 = scmp.lt.s32.totalorder %s925_s27, %s925_s27 }
  0x2d   :  { %p932_p8 = por %p931_p7, %p930_p6 }
  0x2f   :  { %p933_p9 = pnand %p932_p8, %p926_p5 }
  0x31   :  { %936 = shalt.err (!%p933_p9)
}
  0x32   :  { %48 = dma.hbm_to_vmem [thread:$0]  %s1076_s3, 2048, %s43_s10, [#allocation6], %s966_s28, %s966_s28, %s967_s29  }
  0x33   :  { %959 = dma.done.wait [#allocation3], 896  }
  0x34   :  { %960 = vsyncadd [#allocation3], 4294966400 }
  0x35   :  { %961 = dma.done.wait [#allocation6], 14592  }
  0x36   :  { %962 = vsyncadd [#allocation6], 4294952704  ;;  %v83_v0 = vld [vmem:[#allocation5 + $0x80] sm:$0xff]  ;;  %v84_v1 = vld [vmem:[#allocation5 + $0x88] sm:$0xff]  ;;  %vm971_vm0 = vmmov 0   ;;  %vm172_vm1 = vcmask 130048  }
  0x37   :  { %v67_v2 = vld [vmem:[#allocation5] sm:$0xff]  ;;  %v739_v3 = vpack.c.bf16 %v84_v1, %v83_v0  ;;  %v68_v4 = vld [vmem:[#allocation5 + $0x8] sm:$0xff]  ;;  %v85_v11 = vld [vmem:[#allocation5 + $0x90] sm:$0xff]  ;;  %vm551_vm2 = vcmask 80896  }
  0x38   :  { %v115_v5 = vld [vmem:[#allocation5 + $0x180] sm:$0xff]  ;;  %v116_v6 = vld [vmem:[#allocation5 + $0x188] sm:$0xff]  ;;  %v741_v7 = vpack.c.bf16 %v68_v4, %v67_v2  ;;  %v86_v13 = vld [vmem:[#allocation5 + $0x98] sm:$0xff] }
  0x39   :  { %v771_v8 = vpack.c.bf16 %v116_v6, %v115_v5  ;;  %v99_v9 = vld [vmem:[#allocation5 + $0x100] sm:$0xff]  ;;  %v100_v10 = vld [vmem:[#allocation5 + $0x108] sm:$0xff]  ;;  %740 = vmatprep.subr.bf16.mxu0 %v739_v3  ;;  %v69_v14 = vld [vmem:[#allocation5 + $0x10] sm:$0xff]  ;;  %v743_v16 = vpack.c.bf16 %v86_v13, %v85_v11 }
  0x3a   :  { %v773_v12 = vpack.c.bf16 %v100_v10, %v99_v9  ;;  %v70_v15 = vld [vmem:[#allocation5 + $0x18] sm:$0xff]  ;;  %742 = vmatpush3.bf16.msra.mxu0 %v741_v7  ;;  %v117_v18 = vld [vmem:[#allocation5 + $0x190] sm:$0xff]  ;;  %v87_v23 = vld [vmem:[#allocation5 + $0xa0] sm:$0xff] }
  0x3b   :  { %772 = vmatprep.subr.bf16.mxu1 %v771_v8  ;;  %v745_v17 = vpack.c.bf16 %v70_v15, %v69_v14  ;;  %v118_v19 = vld [vmem:[#allocation5 + $0x198] sm:$0xff]  ;;  %v101_v20 = vld [vmem:[#allocation5 + $0x110] sm:$0xff]  ;;  %v88_v24 = vld [vmem:[#allocation5 + $0xa8] sm:$0xff]  ;;  %744 = vmatprep.subr.bf16.mxu0 %v743_v16 }
  0x3c   :  { %774 = vmatpush3.bf16.msra.mxu1 %v773_v12  ;;  %v775_v21 = vpack.c.bf16 %v118_v19, %v117_v18  ;;  %v102_v22 = vld [vmem:[#allocation5 + $0x118] sm:$0xff]  ;;  %v747_v26 = vpack.c.bf16 %v88_v24, %v87_v23  ;;  %v71_v27 = vld [vmem:[#allocation5 + $0x20] sm:$0xff]  ;;  %v72_v28 = vld [vmem:[#allocation5 + $0x28] sm:$0xff] }
  0x3d   :  { %v777_v25 = vpack.c.bf16 %v102_v22, %v101_v20  ;;  %v119_v29 = vld [vmem:[#allocation5 + $0x1a0] sm:$0xff]  ;;  %v120_v30 = vld [vmem:[#allocation5 + $0x1a8] sm:$0xff]  ;;  %v749_v33 = vpack.c.bf16 %v72_v28, %v71_v27  ;;  %v89_v35 = vld [vmem:[#allocation5 + $0xb0] sm:$0xff] }
  0x3e   :  { %776 = vmatprep.subr.bf16.mxu1 %v775_v21  ;;  %v103_v31 = vld [vmem:[#allocation5 + $0x120] sm:$0xff]  ;;  %v104_v32 = vld [vmem:[#allocation5 + $0x128] sm:$0xff]  ;;  %746 = vmatpush3.bf16.msra.mxu0 %v745_v17  ;;  %v779_v34 = vpack.c.bf16 %v120_v30, %v119_v29  ;;  %v90_v36 = vld [vmem:[#allocation5 + $0xb8] sm:$0xff] }
  0x3f   :  { %v73_v37 = vld [vmem:[#allocation5 + $0x30] sm:$0xff]  ;;  %748 = vmatprep.subr.bf16.mxu0 %v747_v26  ;;  %v781_v38 = vpack.c.bf16 %v104_v32, %v103_v31  ;;  %v751_v39 = vpack.c.bf16 %v90_v36, %v89_v35  ;;  %v74_v40 = vld [vmem:[#allocation5 + $0x38] sm:$0xff]  ;;  %v91_v46 = vld [vmem:[#allocation5 + $0xc0] sm:$0xff] }
  0x40   :  { %778 = vmatpush3.bf16.msra.mxu1 %v777_v25  ;;  %v121_v41 = vld [vmem:[#allocation5 + $0x1b0] sm:$0xff]  ;;  %v122_v42 = vld [vmem:[#allocation5 + $0x1b8] sm:$0xff]  ;;  %v92_v47 = vld [vmem:[#allocation5 + $0xc8] sm:$0xff]  ;;  %v753_v48 = vpack.c.bf16 %v74_v40, %v73_v37 }
  0x41   :  { %780 = vmatprep.subr.bf16.mxu1 %v779_v34  ;;  %v783_v43 = vpack.c.bf16 %v122_v42, %v121_v41  ;;  %v105_v44 = vld [vmem:[#allocation5 + $0x130] sm:$0xff]  ;;  %v106_v45 = vld [vmem:[#allocation5 + $0x138] sm:$0xff]  ;;  %v123_v49 = vld [vmem:[#allocation5 + $0x1c0] sm:$0xff]  ;;  %v755_v52 = vpack.c.bf16 %v92_v47, %v91_v46 }
  0x42   :  { %750 = vmatpush3.bf16.msra.mxu0 %v749_v33  ;;  %v124_v50 = vld [vmem:[#allocation5 + $0x1c8] sm:$0xff]  ;;  %v785_v51 = vpack.c.bf16 %v106_v45, %v105_v44  ;;  %v75_v53 = vld [vmem:[#allocation5 + $0x40] sm:$0xff]  ;;  %v93_v58 = vld [vmem:[#allocation5 + $0xd0] sm:$0xff] }
  0x43   :  { %752 = vmatprep.subr.bf16.mxu0 %v751_v39  ;;  %v76_v54 = vld [vmem:[#allocation5 + $0x48] sm:$0xff]  ;;  %v107_v55 = vld [vmem:[#allocation5 + $0x140] sm:$0xff]  ;;  %v787_v56 = vpack.c.bf16 %v124_v50, %v123_v49  ;;  %v94_v59 = vld [vmem:[#allocation5 + $0xd8] sm:$0xff]  ;;  %v970_v50 = vmov 0.0|0.0  }
  0x44   :  { %782 = vmatpush3.bf16.msra.mxu1 %v781_v38  ;;  %v108_v57 = vld [vmem:[#allocation5 + $0x148] sm:$0xff]  ;;  %v125_v60 = vld [vmem:[#allocation5 + $0x1d0] sm:$0xff]  ;;  %v126_v61 = vld [vmem:[#allocation5 + $0x1d8] sm:$0xff]  ;;  %v757_v62 = vpack.c.bf16 %v76_v54, %v75_v53  ;;  %v759_v0 = vpack.c.bf16 %v94_v59, %v93_v58 }
  0x45   :  { %784 = vmatprep.subr.bf16.mxu1 %v783_v43  ;;  %v789_v63 = vpack.c.bf16 %v108_v57, %v107_v55  ;;  %v77_v1 = vld [vmem:[#allocation5 + $0x50] sm:$0xff]  ;;  %v78_v2 = vld [vmem:[#allocation5 + $0x58] sm:$0xff]  ;;  %v791_v4 = vpack.c.bf16 %v126_v61, %v125_v60  ;;  %v95_v6 = vld [vmem:[#allocation5 + $0xe0] sm:$0xff]  ;;  %v972_v60 = vmov 0.0  }
  0x46   :  { %754 = vmatpush3.bf16.msra.mxu0 %v753_v48  ;;  %v109_v3 = vld [vmem:[#allocation5 + $0x150] sm:$0xff]  ;;  %v110_v5 = vld [vmem:[#allocation5 + $0x158] sm:$0xff]  ;;  %v96_v7 = vld [vmem:[#allocation5 + $0xe8] sm:$0xff]  ;;  %v761_v10 = vpack.c.bf16 %v78_v2, %v77_v1 }
  0x47   :  { %756 = vmatprep.subr.bf16.mxu0 %v755_v52  ;;  %v127_v8 = vld [vmem:[#allocation5 + $0x1e0] sm:$0xff]  ;;  %v128_v9 = vld [vmem:[#allocation5 + $0x1e8] sm:$0xff]  ;;  %v61_v12 = vld [vmem:[#allocation2 + $0x8] sm:$0xff]  ;;  %v793_v13 = vpack.c.bf16 %v110_v5, %v109_v3  ;;  %v763_v14 = vpack.c.bf16 %v96_v7, %v95_v6 }
  0x48   :  { %786 = vmatpush3.bf16.msra.mxu1 %v785_v51  ;;  %v79_v11 = vld [vmem:[#allocation5 + $0x60] sm:$0xff]  ;;  %v80_v15 = vld [vmem:[#allocation5 + $0x68] sm:$0xff]  ;;  %v795_v18 = vpack.c.bf16 %v128_v9, %v127_v8  ;;  %v97_v19 = vld [vmem:[#allocation5 + $0xf0] sm:$0xff]  ;;  %240 = vmatprep.mubr.f32.mxu0 %v61_v12 }
  0x49   :  { %788 = vmatprep.subr.bf16.mxu1 %v787_v56  ;;  %v111_v16 = vld [vmem:[#allocation5 + $0x160] sm:$0xff]  ;;  %v112_v17 = vld [vmem:[#allocation5 + $0x168] sm:$0xff]  ;;  %v98_v20 = vld [vmem:[#allocation5 + $0xf8] sm:$0xff]  ;;  %v765_v24 = vpack.c.bf16 %v80_v15, %v79_v11 }
  0x4a   :  { %758 = vmatpush3.bf16.msra.mxu0 %v757_v62  ;;  %v63_v21 = vld [vmem:[#allocation2 + $0x18] sm:$0xff]  ;;  %v129_v22 = vld [vmem:[#allocation5 + $0x1f0] sm:$0xff]  ;;  %v130_v23 = vld [vmem:[#allocation5 + $0x1f8] sm:$0xff]  ;;  %v797_v25 = vpack.c.bf16 %v112_v17, %v111_v16  ;;  %v767_v26 = vpack.c.bf16 %v98_v20, %v97_v19 }
  0x4b   :  { %760 = vmatprep.subr.bf16.mxu0 %v759_v0  ;;  %310 = vmatprep.mubr.f32.mxu1 %v63_v21  ;;  %v81_v27 = vld [vmem:[#allocation5 + $0x70] sm:$0xff]  ;;  %v82_v28 = vld [vmem:[#allocation5 + $0x78] sm:$0xff]  ;;  %v799_v30 = vpack.c.bf16 %v130_v23, %v129_v22  ;;  %v147_v32 = vld [vmem:[#allocation5 + $0x280] sm:$0xff] }
  0x4c   :  { %790 = vmatpush3.bf16.msra.mxu1 %v789_v63  ;;  %v113_v29 = vld [vmem:[#allocation5 + $0x170] sm:$0xff]  ;;  %v114_v31 = vld [vmem:[#allocation5 + $0x178] sm:$0xff]  ;;  %v148_v33 = vld [vmem:[#allocation5 + $0x288] sm:$0xff]  ;;  %v769_v34 = vpack.c.bf16 %v82_v28, %v81_v27 }
  0x4d   :  { %792 = vmatprep.subr.bf16.mxu1 %v791_v4  ;;  %v801_v35 = vpack.c.bf16 %v114_v31, %v113_v29  ;;  %v803_v36 = vpack.c.bf16 %v148_v33, %v147_v32  ;;  %v131_v37 = vld [vmem:[#allocation5 + $0x200] sm:$0xff]  ;;  %v132_v38 = vld [vmem:[#allocation5 + $0x208] sm:$0xff]  ;;  %v149_v39 = vld [vmem:[#allocation5 + $0x290] sm:$0xff] }
  0x4e   :  { %762 = vmatpush3.bf16.msra.mxu0 %v761_v10  ;;  %v150_v40 = vld [vmem:[#allocation5 + $0x298] sm:$0xff]  ;;  %v60_v41 = vld [vmem:[#allocation2] sm:$0xff]  ;;  %v805_v42 = vpack.c.bf16 %v132_v38, %v131_v37  ;;  %v133_v44 = vld [vmem:[#allocation5 + $0x210] sm:$0xff] }
  0x4f   :  { %764 = vmatprep.subr.bf16.mxu0 %v763_v14  ;;  %v62_v43 = vld [vmem:[#allocation2 + $0x10] sm:$0xff]  ;;  %v807_v45 = vpack.c.bf16 %v150_v40, %v149_v39  ;;  %v151_v47 = vld [vmem:[#allocation5 + $0x2a0] sm:$0xff]  ;;  %v152_v48 = vld [vmem:[#allocation5 + $0x2a8] sm:$0xff] }
  0x50   :  { %794 = vmatpush3.bf16.msra.mxu1 %v793_v13  ;;  %v134_v46 = vld [vmem:[#allocation5 + $0x218] sm:$0xff]  ;;  %v65_v49 = vld [vmem:[#allocation2 + $0x28] sm:$0xff]  ;;  %v163_v51 = vld [vmem:[#allocation5 + $0x300] sm:$0xff]  ;;  %v811_v55 = vpack.c.bf16 %v152_v48, %v151_v47 }
  0x51   :  { %796 = vmatprep.subr.bf16.mxu1 %v795_v18  ;;  %v164_v52 = vld [vmem:[#allocation5 + $0x308] sm:$0xff]  ;;  %v809_v54 = vpack.c.bf16 %v134_v46, %v133_v44  ;;  %v135_v56 = vld [vmem:[#allocation5 + $0x220] sm:$0xff]  ;;  %v153_v58 = vld [vmem:[#allocation5 + $0x2b0] sm:$0xff] }
  0x52   :  { %766 = vmatpush3.bf16.msra.mxu0 %v765_v24  ;;  %v836_v53 = vpack.c.bf16 %v164_v52, %v163_v51  ;;  %v136_v57 = vld [vmem:[#allocation5 + $0x228] sm:$0xff]  ;;  %v154_v59 = vld [vmem:[#allocation5 + $0x2b8] sm:$0xff]  ;;  %v137_v0 = vld [vmem:[#allocation5 + $0x230] sm:$0xff] }
  0x53   :  { %768 = vmatprep.subr.bf16.mxu0 %v767_v26  ;;  %v66_v61 = vld [vmem:[#allocation2 + $0x30] sm:$0xff]  ;;  %v813_v62 = vpack.c.bf16 %v136_v57, %v135_v56  ;;  %v815_v63 = vpack.c.bf16 %v154_v59, %v153_v58  ;;  %v155_v2 = vld [vmem:[#allocation5 + $0x2c0] sm:$0xff]  ;;  %v156_v3 = vld [vmem:[#allocation5 + $0x2c8] sm:$0xff] }
  0x54   :  { %798 = vmatpush3.bf16.msra.mxu1 %v797_v25  ;;  %v138_v1 = vld [vmem:[#allocation5 + $0x238] sm:$0xff]  ;;  %v819_v5 = vpack.c.bf16 %v156_v3, %v155_v2  ;;  %v139_v6 = vld [vmem:[#allocation5 + $0x240] sm:$0xff]  ;;  %v140_v7 = vld [vmem:[#allocation5 + $0x248] sm:$0xff] }
  0x55   :  { %800 = vmatprep.subr.bf16.mxu1 %v799_v30  ;;  %v817_v4 = vpack.c.bf16 %v138_v1, %v137_v0  ;;  %v157_v8 = vld [vmem:[#allocation5 + $0x2d0] sm:$0xff]  ;;  %v158_v9 = vld [vmem:[#allocation5 + $0x2d8] sm:$0xff]  ;;  %v821_v10 = vpack.c.bf16 %v140_v7, %v139_v6  ;;  %v159_v14 = vld [vmem:[#allocation5 + $0x2e0] sm:$0xff] }
  0x56   :  { %770 = vmatpush3.bf16.msra.mxu0 %v769_v34  ;;  %v823_v11 = vpack.c.bf16 %v158_v9, %v157_v8  ;;  %v141_v12 = vld [vmem:[#allocation5 + $0x250] sm:$0xff]  ;;  %v142_v13 = vld [vmem:[#allocation5 + $0x258] sm:$0xff]  ;;  %v160_v15 = vld [vmem:[#allocation5 + $0x2e8] sm:$0xff] }
  0x57   :  { %804 = vmatprep.subr.bf16.mxu0 %v803_v36  ;;  %v825_v16 = vpack.c.bf16 %v142_v13, %v141_v12  ;;  %v827_v17 = vpack.c.bf16 %v160_v15, %v159_v14  ;;  %v143_v18 = vld [vmem:[#allocation5 + $0x260] sm:$0xff]  ;;  %v144_v19 = vld [vmem:[#allocation5 + $0x268] sm:$0xff]  ;;  %v161_v20 = vld [vmem:[#allocation5 + $0x2f0] sm:$0xff] }
  0x58   :  { %802 = vmatpush3.bf16.msra.mxu1 %v801_v35  ;;  %v162_v21 = vld [vmem:[#allocation5 + $0x2f8] sm:$0xff]  ;;  %v829_v22 = vpack.c.bf16 %v144_v19, %v143_v18  ;;  %v145_v24 = vld [vmem:[#allocation5 + $0x270] sm:$0xff]  ;;  %v64_v27 = vld [vmem:[#allocation2 + $0x20] sm:$0xff] }
  0x59   :  { %835 = vmatprep.subr.bf16.mxu1 %v970_v50  ;;  %241 = vmatmul.mubr.f32.vlgmr.msra.gmra.mrb[0].mxu0 %v60_v41  ;;  %v831_v23 = vpack.c.bf16 %v162_v21, %v161_v20  ;;  %v146_v25 = vld [vmem:[#allocation5 + $0x278] sm:$0xff]  ;;  %v457_v28 = vld [vmem:[#allocation7] sm:$0xff]  ;;  %v459_v30 = vld [vmem:[#allocation7 + $0x10] sm:$0xff] }
  0x5a   :  { %806 = vmatpush3.bf16.msra.mxu0 %v805_v42  ;;  %380 = vmatprep.mubr.f32.mxu0 %v65_v49  ;;  %v833_v26 = vpack.c.bf16 %v146_v25, %v145_v24  ;;  %v458_v29 = vld [vmem:[#allocation7 + $0x8] sm:$0xff]  ;;  %v460_v32 = vld [vmem:[#allocation7 + $0x18] sm:$0xff]  ;;  %v461_v34 = vld [vmem:[#allocation7 + $0x20] sm:$0xff] }
  0x5b   :  { %311 = vmatmul.mubr.f32.vlgmr.msra.gmra.mrb[0].mxu1 %v62_v43  ;;  %808 = vmatprep.subr.bf16.mxu0 %v807_v45  ;;  %v839_v31 = vpack.c.bf16 %v458_v29, %v457_v28  ;;  %v842_v33 = vpack.c.bf16 %v460_v32, %v459_v30  ;;  %v462_v35 = vld [vmem:[#allocation7 + $0x28] sm:$0xff]  ;;  %v463_v37 = vld [vmem:[#allocation7 + $0x30] sm:$0xff]  ;;  %v464_v38 = vld [vmem:[#allocation7 + $0x38] sm:$0xff] }
  0x5c   :  { %837 = vmatpush3.bf16.msra.mxu1 %v836_v53  ;;  %701 = vmatprep.mubr.msk.f32.mxu1 %vm971_vm0, %v972_v60  ;;  %v845_v36 = vpack.c.bf16 %v462_v35, %v461_v34  ;;  %v848_v39 = vpack.c.bf16 %v464_v38, %v463_v37  ;;  %v465_v40 = vld [vmem:[#allocation7 + $0x40] sm:$0xff]  ;;  %v466_v41 = vld [vmem:[#allocation7 + $0x48] sm:$0xff]  ;;  %v467_v43 = vld [vmem:[#allocation7 + $0x50] sm:$0xff] }
  0x5d   :  { %838 = vmatprep.subr.bf16.mxu1 %v970_v50  ;;  %v851_v42 = vpack.c.bf16 %v466_v41, %v465_v40  ;;  %v468_v44 = vld [vmem:[#allocation7 + $0x58] sm:$0xff]  ;;  %v469_v46 = vld [vmem:[#allocation7 + $0x60] sm:$0xff]  ;;  %v470_v47 = vld [vmem:[#allocation7 + $0x68] sm:$0xff] }
  0x5e   :  { %810 = vmatpush3.bf16.msra.mxu0 %v809_v54  ;;  %v854_v45 = vpack.c.bf16 %v468_v44, %v467_v43  ;;  %v857_v48 = vpack.c.bf16 %v470_v47, %v469_v46  ;;  %v471_v49 = vld [vmem:[#allocation7 + $0x70] sm:$0xff]  ;;  %v472_v51 = vld [vmem:[#allocation7 + $0x78] sm:$0xff] }
  0x5f   :  { %812 = vmatprep.subr.bf16.mxu0 %v811_v55  ;;  %702 = vmatmul.mubr.msk.f32.vlgmr.msra.gmra.mrb[2].mxu1 %vm172_vm1, %v66_v61  ;;  %v860_v52 = vpack.c.bf16 %v472_v51, %v471_v49  ;;  %v569_v54 = vld [vmem:[%s1075_s2] ss:$0 sm:$0xff]  ;;  %s973_s2 = smov [#allocation8]  }
  0x60   :  { %736 = vmatprep.mubr.msk.f32.mxu1 %vm971_vm0, %v972_v60  ;;  %840 = vmatpush3.bf16.msra.mxu1 %v839_v31  ;;  %s559_s7 = sshll.u32 %s973_s2, 4  ;;  %s560_s7 = int_to_ptr.vmem [resolvable:$true] %s559_s7 }
  0x61   :  { %841 = vmatprep.subr.bf16.mxu1 %v970_v50  ;;  %s937_s8 = scalar_lea.vmem %s560_s7, 128  ;;  %p942_p11 = scmp.lt.s32.totalorder %s560_s7, %s560_s7 }
  0x62   :  { %814 = vmatpush3.bf16.msra.mxu0 %v813_v62  ;;  %p938_p10 = scmp.ne.s32.totalorder %s560_s7, %s937_s8  ;;  %p943_p12 = scmp.lt.s32.totalorder %s937_s8, %s937_s8 }
  0x63   :  { %816 = vmatprep.subr.bf16.mxu0 %v815_v63 }
  0x64   :  { %843 = vmatpush3.bf16.msra.mxu1 %v842_v33  ;;  %p944_p13 = por %p943_p12, %p942_p11 }
  0x65   :  { %844 = vmatprep.subr.bf16.mxu1 %v970_v50 }
  0x66   :  { %818 = vmatpush3.bf16.msra.mxu0 %v817_v4  ;;  %p945_p0 = pnand %p944_p13, %p938_p10 }
  0x67   :  { %820 = vmatprep.subr.bf16.mxu0 %v819_v5  ;;  %v571_v5 = vld [vmem:[%s1077_s4] ss:$0 sm:$0xff] }
  0x68   :  { %846 = vmatpush3.bf16.msra.mxu1 %v845_v36 }
  0x69   :  { %847 = vmatprep.subr.bf16.mxu1 %v970_v50 }
  0x6a   :  { %822 = vmatpush3.bf16.msra.mxu0 %v821_v10 }
  0x6b   :  { %824 = vmatprep.subr.bf16.mxu0 %v823_v11 }
  0x6c   :  { %849 = vmatpush3.bf16.msra.mxu1 %v848_v39 }
  0x6d   :  { %850 = vmatprep.subr.bf16.mxu1 %v970_v50 }
  0x6e   :  { %826 = vmatpush3.bf16.msra.mxu0 %v825_v16 }
  0x6f   :  { %828 = vmatprep.subr.bf16.mxu0 %v827_v17 }
  0x70   :  { %852 = vmatpush3.bf16.msra.mxu1 %v851_v42 }
  0x71   :  { %853 = vmatprep.subr.bf16.mxu1 %v970_v50 }
  0x72   :  { %830 = vmatpush3.bf16.msra.mxu0 %v829_v22 }
  0x73   :  { %832 = vmatprep.subr.bf16.mxu0 %v831_v23 }
  0x74   :  { %855 = vmatpush3.bf16.msra.mxu1 %v854_v45 }
  0x75   :  { %856 = vmatprep.subr.bf16.mxu1 %v970_v50 }
  0x76   :  { %834 = vmatpush3.bf16.msra.mxu0 %v833_v26 }
  0x78   :  { %858 = vmatpush3.bf16.msra.mxu1 %v857_v48 }
  0x79   :  { %381 = vmatmul.mubr.f32.vlgmr.msra.gmra.mrb[2].mxu0 %v64_v27  ;;  %859 = vmatprep.subr.bf16.mxu1 %v970_v50 }
  0x7c   :  { %861 = vmatpush3.bf16.msra.mxu1 %v860_v52 }
 0x12c   :  { %v604_v53 = vpop.f32.mrb[0].mxu0 }
 0x12d   :  { %v605_v55 = vpop.f32.mrb[1].mxu0 }
 0x12e   :  { %v639_v56 = vpop.f32.mrb[0].mxu1  ;;  %v606_v57 = vadd.f32 %v605_v55, %v604_v53 }
 0x12f   :  { %v640_v58 = vpop.f32.mrb[1].mxu1 }
 0x130   :  { %v641_v59 = vadd.f32 %v640_v58, %v639_v56  ;;  %v243_v60 = vadd.f32 %v606_v57, %v569_v54 }
 0x132   :  { %v313_v61 = vadd.f32 %v641_v59, %v243_v60  ;;  %v452_v62 = vpop.f32.mrb[2].mxu1 }
 0x133   :  { %v703_v63 = vpop.f32.mrb[3].mxu1 }
 0x14c   :  { %v674_v0 = vpop.f32.mrb[2].mxu0 }
 0x14d   :  { %v675_v50 = vpop.f32.mrb[3].mxu0 }
 0x14e   :  { %v676_v1 = vadd.f32 %v675_v50, %v674_v0 }
 0x150   :  { %v383_v2 = vadd.f32 %v676_v1, %v313_v61 }
 0x152   :  { %v453_v3 = vadd.f32 %v452_v62, %v383_v2 }
 0x154   :  { %v456_v4 = vmax.f32 %v453_v3, 0.0 }
 0x156   :  { %737 = vmatmul.mubr.f32.vlgmr.msra.gmra.mrb[4].mxu1 %v456_v4 }
 0x229   :  { %v539_v6 = vpop.f32.mrb[4].mxu1 }
 0x22a   :  { %v550_v7 = vadd.f32 %v571_v5, %v539_v6  ;;  %v738_v8 = vpop.f32.mrb[5].mxu1 }
 0x22c   :  { %552 = vst.msk [vmem:[#allocation8] sm:$0xff] %vm551_vm2, %v550_v7 }
 0x22d   :  { %948 = shalt.err (!%p945_p0)
}
 0x22e   :  { %s949_s11 = scalar_lea.hbm %s1078_s5, 128 }
 0x22f   :  { %p950_p1 = scmp.ne.s32.totalorder %s1078_s5, %s949_s11  ;;  %p953_p2 = scmp.lt.u32.totalorder %s949_s11, %s1078_s5 }
 0x231   :  { %p955_p3 = pnand %p953_p2, %p950_p1 }
 0x233   :  { %958 = shalt.err (!%p955_p3)
}
 0x234   :  { %562 = dma.vmem_to_hbm [thread:$0]  %s560_s7, 128, %s1078_s5, [#allocation4]  }
 0x235   :  { %963 = dma.done.wait [#allocation4], 128  }
 0x236   :  { %964 = vsyncadd [#allocation4], 4294967168 }
 0x237   :  { %566 = vsyncpa [#allocation3], 1 }
 0x238   :  { %567 = vsyncpa [#allocation6], 1 }
 0x239   :  { %568 = vsyncpa [#allocation4], 1 }

</bundles_post_ra>
